<compile_context>
chip_gen: v5e
topology: v5e:2x2
jax: 0.10.0
libtpu: 0.0.40
codegen_flags: <defaults>
</compile_context>

<pallas_src>
import functools

import numpy as np

import jax
import jax.numpy as jnp
from jax.experimental import pallas as pl
from jax.experimental.pallas import tpu as pltpu


def _fvsbn_kernel(n_ids, k_ids, x_ref, wt_ref, b_ref, o_ref, acc_ref,
                  *, inv_num_layers):
    # n_ids/k_ids: SMEM (n_steps,) i32   x:(TB,TK) bf16   wt:(TK,TN) bf16
    # b:(1,TN) f32   o:(TB,1) f32        acc:(TB,TN) f32 scratch
    s = pl.program_id(1)          # flat triangular step index
    n = n_ids[s]                  # position (output-column) block
    k = k_ids[s]                  # contraction (input-feature) block

    # Zero the per-row log-likelihood accumulator once per batch block.
    @pl.when(s == 0)
    def _():
        o_ref[...] = jnp.zeros_like(o_ref)

    # Start the logit accumulator from the bias row (bias add folded into init).
    @pl.when(k == 0)
    def _():
        acc_ref[...] = jnp.broadcast_to(b_ref[...], acc_ref.shape).astype(jnp.float32)

    # Every scheduled step has k <= n by construction, so the matmul is
    # unconditional (no wasted grid steps, no structural-zero blocks).
    acc_ref[...] += jnp.dot(x_ref[...], wt_ref[...],
                            preferred_element_type=jnp.float32)

    # k == n is the last contributing K block for this position block:
    # elementwise Bernoulli term, reduced over the TN position lanes.
    @pl.when(k == n)
    def _():
        z = acc_ref[...]                                   # f32 logits
        e = jnp.exp(-jnp.abs(z))                           # in (0,1], never overflows
        r = pl.reciprocal(1.0 + e, approx=True)            # EUP reciprocal
        p = jnp.where(z >= 0, r, 1.0 - r)                  # sigmoid(z), two-sided stable
        logp = jnp.minimum(z, 0.0) - jnp.log(1.0 + e)      # log(sigmoid(z)), stable
        # p*log(p) + (1-p)*(1 - log(p))  ==  (1 - p) + log(p) * (2p - 1)
        term = (1.0 - p) + logp * (2.0 * p - 1.0)
        o_ref[...] += jnp.sum(term, axis=-1, keepdims=True)   # (TB, 1)

    # Apply the 1/num_layers scale exactly once per batch block (final step).
    @pl.when(s == pl.num_programs(1) - 1)
    def _():
        o_ref[...] = o_ref[...] * jnp.float32(inv_num_layers)


def fvsbn_forward(x, wt, b, num_layers, *, tb=512, tn=None):
    """x:(B,D), wt:(D,D) strictly-upper-triangular packed, b:(1,D).

    x / wt should already be bf16 (casts hoisted to pack time); f32 inputs are
    cast here as a fallback.  Output: (B,) f32.
    """
    B, D = x.shape

    # --- tile selection ------------------------------------------------------
    if tn is None:
        if D <= 2048:
            tn = D                      # fast path: whole Wt column range per step
        elif D % 512 == 0:
            tn = 512
        elif D % 256 == 0:
            tn = 256
        else:
            tn = 128
    tn = min(tn, D)
    tk = tn                             # square Wt tiles -> exact triangular skip

    tb = min(tb, B)
    # v7x megacore: make sure the "parallel" batch axis has >= 2 blocks.
    if B // tb < 2 and B >= 16 and B % 2 == 0 and (B // 2) % 8 == 0:
        tb = B // 2
    assert B % tb == 0 and D % tn == 0, (B, tb, D, tn)

    nb, nn = B // tb, D // tn

    # --- flat triangular schedule: only (n, k) pairs with k <= n --------------
    n_list, k_list = [], []
    for n in range(nn):
        for k in range(n + 1):
            n_list.append(n)
            k_list.append(k)
    n_steps = len(n_list)
    n_ids = jnp.asarray(n_list, jnp.int32)
    k_ids = jnp.asarray(k_list, jnp.int32)

    # Casts hoisted to pack/build time; these are no-ops on the intended path.
    x_bf = x if x.dtype == jnp.bfloat16 else x.astype(jnp.bfloat16)
    wt_bf = wt if wt.dtype == jnp.bfloat16 else wt.astype(jnp.bfloat16)
    b_f32 = b if b.dtype == jnp.float32 else b.astype(jnp.float32)

    # Advisory cost: count the real (refetch-inclusive) HBM streams.
    cost = pl.CostEstimate(
        flops=2 * B * n_steps * tk * tn,
        transcendentals=3 * B * D,
        bytes_accessed=(nb * n_steps * tb * tk * 2      # x stream (refetched per n)
                        + nb * n_steps * tk * tn * 2    # Wt stream (refetched per batch blk)
                        + nb * n_steps * tn * 4         # bias row per step
                        + B * 4))                       # output

    # Double-buffered bf16 x/Wt/bias tiles + f32 accumulator, with headroom.
    vmem_bytes = 2 * (tb * tk * 2 + tk * tn * 2 + tn * 4) + tb * tn * 4 + 2 * tb * 4
    vmem_limit = int(min(max(32 * 1024 * 1024, 2 * vmem_bytes), 56 * 1024 * 1024))

    kernel = functools.partial(_fvsbn_kernel, inv_num_layers=1.0 / float(num_layers))

    out = pl.pallas_call(
        kernel,
        out_shape=jax.ShapeDtypeStruct((B, 1), jnp.float32),
        grid_spec=pltpu.PrefetchScalarGridSpec(
            num_scalar_prefetch=2,
            grid=(nb, n_steps),
            in_specs=[
                # x tile (TB, TK) at contraction block k of this step.
                pl.BlockSpec((tb, tk), lambda bi, s, nid, kid: (bi, kid[s])),
                # Wt tile (TK, TN): block (k, n) — always k <= n (nonzero blocks only).
                pl.BlockSpec((tk, tn), lambda bi, s, nid, kid: (kid[s], nid[s])),
                # Bias row for this position block.
                pl.BlockSpec((1, tn), lambda bi, s, nid, kid: (0, nid[s])),
            ],
            out_specs=pl.BlockSpec((tb, 1), lambda bi, s, nid, kid: (bi, 0)),
            scratch_shapes=[pltpu.VMEM((tb, tn), jnp.float32)],
        ),
        compiler_params=pltpu.CompilerParams(
            dimension_semantics=("parallel", "arbitrary"),
            vmem_limit_bytes=vmem_limit),
        cost_estimate=cost,
    )(n_ids, k_ids, x_bf, wt_bf, b_f32)
    # TODO(synk): output kept as a lane-sparse (B, 1) column; a lane-dense (1, B)
    # layout would force all batch blocks onto one output tile and lose the
    # megacore batch split, and total output traffic is only 4*B bytes anyway.
    return out[:, 0]  # (B,)


def build_params(key, input_dim):
    """PyTorch-style U(-1/sqrt(fan_in), 1/sqrt(fan_in)) init for Linear(max(1,i), 1)."""
    kw, kb = jax.random.split(key)
    fan_in = np.maximum(np.arange(input_dim), 1).astype(np.float32)
    bound = 1.0 / np.sqrt(fan_in)                                           # (D,)
    w_full = np.asarray(jax.random.uniform(kw, (input_dim, input_dim),
                                           jnp.float32, -1.0, 1.0)) * bound[None, :]
    biases = np.asarray(jax.random.uniform(kb, (input_dim,),
                                           jnp.float32, -1.0, 1.0)) * bound
    return w_full.astype(np.float32), biases.astype(np.float32)


def pack_dense(w_full, biases):
    """Masked, transposed weight matrix (stored bf16 — cast hoisted out of the call)
    plus bias row for the single-matmul form."""
    D = w_full.shape[0]
    mask = np.triu(np.ones((D, D), np.float32), k=1)   # Wt[j, i] nonzero iff j < i
    wt = (w_full * mask).astype(np.float32)            # column 0 all zero
    b = biases.reshape(1, D).astype(np.float32)
    return jnp.asarray(wt, jnp.bfloat16), jnp.asarray(b, jnp.float32)


def reference_forward(x, w_full, biases, input_dim, num_layers):
    """float64 numpy loop mirroring the PyTorch forward exactly."""
    x = np.asarray(x, np.float64)
    w = w_full.astype(np.float64)
    bia = biases.astype(np.float64)
    B = x.shape[0]
    sig = lambda z: 1.0 / (1.0 + np.exp(-z))
    p = sig(np.zeros(B) + bia[0])                       # position 0: zero input
    ll = p * np.log(p) + (1.0 - p) * (1.0 - np.log(p))
    for i in range(1, input_dim):
        p = sig(x[:, :i] @ w[:i, i] + bia[i])
        ll = ll + p * np.log(p) + (1.0 - p) * (1.0 - np.log(p))
    return ll / num_layers


if __name__ == "__main__":
    B = 32            # -> 2 batch blocks of 16 rows (exercises the parallel batch axis)
    INPUT_DIM = 256
    NUM_LAYERS = INPUT_DIM

    key = jax.random.PRNGKey(0)
    key, kx = jax.random.split(key)
    # Binary inputs (FVSBN models binary pixels) -> exact in bf16; built as bf16
    # so the forward never pays a per-call cast.
    x_f32 = (jax.random.uniform(kx, (B, INPUT_DIM)) > 0.5).astype(jnp.float32)
    x = x_f32.astype(jnp.bfloat16)

    w_full, biases = build_params(key, INPUT_DIM)
    wt, b = pack_dense(w_full, biases)

    ref = reference_forward(np.asarray(x_f32), w_full, biases, INPUT_DIM, NUM_LAYERS)

    # 1) Default path: tn = tk = D (single step per batch block, Wt fetched once).
    out = jax.block_until_ready(fvsbn_forward(x, wt, b, NUM_LAYERS))
    assert out.shape == (B,)
    err = float(np.max(np.abs(np.asarray(out, np.float64) - ref)))
    assert err < 2e-2, ("fast path", err, np.asarray(out)[:4], ref[:4])

    # 2) Forced smaller tiles -> exercises the flat triangular schedule
    #    (multiple (n, k) steps, k == 0 / k == n gates, acc reuse across K).
    out2 = jax.block_until_ready(fvsbn_forward(x, wt, b, NUM_LAYERS, tn=128))
    err2 = float(np.max(np.abs(np.asarray(out2, np.float64) - ref)))
    assert err2 < 2e-2, ("triangular path", err2, np.asarray(out2)[:4], ref[:4])

    print("KERNEL_OK")
</pallas_src>

<mosaic_0001>
module attributes {stable_mosaic.version = 11 : i64} {
  func.func @_fvsbn_kernel(%arg0: i32, %arg1: i32, %arg2: memref<1xi32, #tpu.memory_space<smem>>, %arg3: memref<1xi32, #tpu.memory_space<smem>>, %arg4: memref<16x256xbf16, #tpu.memory_space<vmem>>, %arg5: memref<256x256xbf16, #tpu.memory_space<vmem>>, %arg6: memref<1x256xf32, #tpu.memory_space<vmem>>, %arg7: memref<16x1xf32, #tpu.memory_space<vmem>>, %arg8: memref<16x256xf32, #tpu.memory_space<vmem>>) attributes {dimension_semantics = [#tpu.dimension_semantics<parallel>, #tpu.dimension_semantics<arbitrary>], iteration_bounds = array<i64: 2, 1>, scalar_prefetch = 2 : i64, scratch_operands = 1 : i64, tpu.core_type = #tpu.core_type<tc>, window_params = [{transform_indices = @transform_0, window_bounds = array<i64: 16, 256>}, {transform_indices = @transform_1, window_bounds = array<i64: 256, 256>}, {transform_indices = @transform_2, window_bounds = array<i64: 1, 256>}, {transform_indices = @transform_3, window_bounds = array<i64: 16, 1>}]} {
    %0 = arith.index_cast %arg1 : i32 to index
    %1 = memref.load %arg2[%0] : memref<1xi32, #tpu.memory_space<smem>>
    %2 = arith.index_cast %arg1 : i32 to index
    %3 = memref.load %arg3[%2] : memref<1xi32, #tpu.memory_space<smem>>
    %c0_i32 = arith.constant 0 : i32
    %4 = arith.cmpi eq, %arg1, %c0_i32 : i32
    %5 = arith.extui %4 : i1 to i32
    %c0_i32_0 = arith.constant 0 : i32
    %6 = arith.cmpi ne, %5, %c0_i32_0 : i32
    scf.if %6 {
      %cst_13 = arith.constant 0.000000e+00 : f32
      %22 = vector.broadcast %cst_13 : f32 to vector<16x1xf32>
      %c0_14 = arith.constant 0 : index
      %c0_15 = arith.constant 0 : index
      %23 = vector.load %arg7[%c0_14, %c0_15] : memref<16x1xf32, #tpu.memory_space<vmem>>, vector<16x1xf32>
      tpu.vector_store %arg7[%c0_14, %c0_15], %22 {strides = array<i32>} : memref<16x1xf32, #tpu.memory_space<vmem>>, vector<16x1xf32>,
    } else {
    }
    %c0_i32_1 = arith.constant 0 : i32
    %7 = arith.cmpi eq, %3, %c0_i32_1 : i32
    %8 = arith.extui %7 : i1 to i32
    %c0_i32_2 = arith.constant 0 : i32
    %9 = arith.cmpi ne, %8, %c0_i32_2 : i32
    scf.if %9 {
      %c0_13 = arith.constant 0 : index
      %c0_14 = arith.constant 0 : index
      %22 = vector.load %arg6[%c0_13, %c0_14] : memref<1x256xf32, #tpu.memory_space<vmem>>, vector<1x256xf32>
      %23 = vector.shape_cast %22 : vector<1x256xf32> to vector<1x256xf32>
      %24 = vector.broadcast %23 : vector<1x256xf32> to vector<16x256xf32>
      %c0_15 = arith.constant 0 : index
      %c0_16 = arith.constant 0 : index
      %25 = vector.load %arg8[%c0_15, %c0_16] : memref<16x256xf32, #tpu.memory_space<vmem>>, vector<16x256xf32>
      tpu.vector_store %arg8[%c0_15, %c0_16], %24 {strides = array<i32>} : memref<16x256xf32, #tpu.memory_space<vmem>>, vector<16x256xf32>,
    } else {
    }
    %c0 = arith.constant 0 : index
    %c0_3 = arith.constant 0 : index
    %10 = vector.load %arg8[%c0, %c0_3] : memref<16x256xf32, #tpu.memory_space<vmem>>, vector<16x256xf32>
    %c0_4 = arith.constant 0 : index
    %c0_5 = arith.constant 0 : index
    %11 = vector.load %arg4[%c0_4, %c0_5] : memref<16x256xbf16, #tpu.memory_space<vmem>>, vector<16x256xbf16>
    %c0_6 = arith.constant 0 : index
    %c0_7 = arith.constant 0 : index
    %12 = vector.load %arg5[%c0_6, %c0_7] : memref<256x256xbf16, #tpu.memory_space<vmem>>, vector<256x256xbf16>
    %cst = arith.constant dense<0.000000e+00> : vector<16x256xf32>
    %13 = tpu.matmul %11, %12, %cst {dimension_numbers = #tpu.dot_dimension_numbers<[1], [0], [0], [1], [0, 0, 1, 1], [], []>} : vector<16x256xbf16>, vector<256x256xbf16>, vector<16x256xf32> -> vector<16x256xf32>
    %14 = arith.addf %10, %13 : vector<16x256xf32>
    %c0_8 = arith.constant 0 : index
    %c0_9 = arith.constant 0 : index
    %15 = vector.load %arg8[%c0_8, %c0_9] : memref<16x256xf32, #tpu.memory_space<vmem>>, vector<16x256xf32>
    tpu.vector_store %arg8[%c0_8, %c0_9], %14 {strides = array<i32>} : memref<16x256xf32, #tpu.memory_space<vmem>>, vector<16x256xf32>,
    %16 = arith.cmpi eq, %3, %1 : i32
    %17 = arith.extui %16 : i1 to i32
    %c0_i32_10 = arith.constant 0 : i32
    %18 = arith.cmpi ne, %17, %c0_i32_10 : i32
    scf.if %18 {
      %c0_13 = arith.constant 0 : index
      %c0_14 = arith.constant 0 : index
      %22 = vector.load %arg8[%c0_13, %c0_14] : memref<16x256xf32, #tpu.memory_space<vmem>>, vector<16x256xf32>
      %23 = math.absf %22 : vector<16x256xf32>
      %cst_15 = arith.constant 0.000000e+00 : f32
      %24 = vector.broadcast %cst_15 : f32 to vector<16x256xf32>
      %25 = arith.subf %24, %23 : vector<16x256xf32>
      %26 = math.exp %25 : vector<16x256xf32>
      %cst_16 = arith.constant 1.000000e+00 : f32
      %27 = vector.broadcast %cst_16 : f32 to vector<16x256xf32>
      %28 = arith.addf %27, %26 : vector<16x256xf32>
      %29 = tpu.reciprocal %28 {approx = true} : vector<16x256xf32> -> vector<16x256xf32>
      %cst_17 = arith.constant 0.000000e+00 : f32
      %30 = vector.broadcast %cst_17 : f32 to vector<16x256xf32>
      %31 = arith.cmpf oge, %22, %30 : vector<16x256xf32>
      %cst_18 = arith.constant 1.000000e+00 : f32
      %32 = vector.broadcast %cst_18 : f32 to vector<16x256xf32>
      %33 = arith.subf %32, %29 : vector<16x256xf32>
      %34 = arith.select %31, %29, %33 : vector<16x256xi1>, vector<16x256xf32>
      %cst_19 = arith.constant 0.000000e+00 : f32
      %35 = vector.broadcast %cst_19 : f32 to vector<16x256xf32>
      %36 = arith.minimumf %22, %35 : vector<16x256xf32>
      %cst_20 = arith.constant 1.000000e+00 : f32
      %37 = vector.broadcast %cst_20 : f32 to vector<16x256xf32>
      %38 = arith.addf %37, %26 : vector<16x256xf32>
      %39 = math.log %38 : vector<16x256xf32>
      %40 = arith.subf %36, %39 : vector<16x256xf32>
      %cst_21 = arith.constant 1.000000e+00 : f32
      %41 = vector.broadcast %cst_21 : f32 to vector<16x256xf32>
      %42 = arith.subf %41, %34 : vector<16x256xf32>
      %cst_22 = arith.constant 2.000000e+00 : f32
      %43 = vector.broadcast %cst_22 : f32 to vector<16x256xf32>
      %44 = arith.mulf %43, %34 : vector<16x256xf32>
      %cst_23 = arith.constant 1.000000e+00 : f32
      %45 = vector.broadcast %cst_23 : f32 to vector<16x256xf32>
      %46 = arith.subf %44, %45 : vector<16x256xf32>
      %47 = arith.mulf %40, %46 : vector<16x256xf32>
      %48 = arith.addf %42, %47 : vector<16x256xf32>
      %c0_24 = arith.constant 0 : index
      %c0_25 = arith.constant 0 : index
      %49 = vector.load %arg7[%c0_24, %c0_25] : memref<16x1xf32, #tpu.memory_space<vmem>>, vector<16x1xf32>
      %cst_26 = arith.constant dense<0.000000e+00> : vector<16xf32>
      %50 = vector.multi_reduction <add>, %48, %cst_26 [1] : vector<16x256xf32> to vector<16xf32>
      %51 = vector.shape_cast %50 : vector<16xf32> to vector<16x1xf32>
      %52 = arith.addf %49, %51 : vector<16x1xf32>
      %c0_27 = arith.constant 0 : index
      %c0_28 = arith.constant 0 : index
      %53 = vector.load %arg7[%c0_27, %c0_28] : memref<16x1xf32, #tpu.memory_space<vmem>>, vector<16x1xf32>
      tpu.vector_store %arg7[%c0_27, %c0_28], %52 {strides = array<i32>} : memref<16x1xf32, #tpu.memory_space<vmem>>, vector<16x1xf32>,
    } else {
    }
    %c0_i32_11 = arith.constant 0 : i32
    %19 = arith.cmpi eq, %arg1, %c0_i32_11 : i32
    %20 = arith.extui %19 : i1 to i32
    %c0_i32_12 = arith.constant 0 : i32
    %21 = arith.cmpi ne, %20, %c0_i32_12 : i32
    scf.if %21 {
      %c0_13 = arith.constant 0 : index
      %c0_14 = arith.constant 0 : index
      %22 = vector.load %arg7[%c0_13, %c0_14] : memref<16x1xf32, #tpu.memory_space<vmem>>, vector<16x1xf32>
      %cst_15 = arith.constant 3.906250e-03 : f32
      %23 = vector.broadcast %cst_15 : f32 to vector<16x1xf32>
      %24 = arith.mulf %22, %23 : vector<16x1xf32>
      %c0_16 = arith.constant 0 : index
      %c0_17 = arith.constant 0 : index
      %25 = vector.load %arg7[%c0_16, %c0_17] : memref<16x1xf32, #tpu.memory_space<vmem>>, vector<16x1xf32>
      tpu.vector_store %arg7[%c0_16, %c0_17], %24 {strides = array<i32>} : memref<16x1xf32, #tpu.memory_space<vmem>>, vector<16x1xf32>,
    } else {
    }
    return
  }
  func.func @transform_0(%arg0: i32, %arg1: i32, %arg2: memref<1xi32, #tpu.memory_space<smem>>, %arg3: memref<1xi32, #tpu.memory_space<smem>>) -> (i32, i32) {
    %0 = arith.index_cast %arg1 : i32 to index
    %1 = memref.load %arg3[%0] : memref<1xi32, #tpu.memory_space<smem>>
    %c0_i32 = arith.constant 0 : i32
    return %arg0, %1 : i32, i32
  }
  func.func @transform_1(%arg0: i32, %arg1: i32, %arg2: memref<1xi32, #tpu.memory_space<smem>>, %arg3: memref<1xi32, #tpu.memory_space<smem>>) -> (i32, i32) {
    %0 = arith.index_cast %arg1 : i32 to index
    %1 = memref.load %arg3[%0] : memref<1xi32, #tpu.memory_space<smem>>
    %2 = arith.index_cast %arg1 : i32 to index
    %3 = memref.load %arg2[%2] : memref<1xi32, #tpu.memory_space<smem>>
    %c0_i32 = arith.constant 0 : i32
    return %1, %3 : i32, i32
  }
  func.func @transform_2(%arg0: i32, %arg1: i32, %arg2: memref<1xi32, #tpu.memory_space<smem>>, %arg3: memref<1xi32, #tpu.memory_space<smem>>) -> (i32, i32) {
    %0 = arith.index_cast %arg1 : i32 to index
    %1 = memref.load %arg2[%0] : memref<1xi32, #tpu.memory_space<smem>>
    %c0_i32 = arith.constant 0 : i32
    %c0_i32_0 = arith.constant 0 : i32
    return %c0_i32, %1 : i32, i32
  }
  func.func @transform_3(%arg0: i32, %arg1: i32, %arg2: memref<1xi32, #tpu.memory_space<smem>>, %arg3: memref<1xi32, #tpu.memory_space<smem>>) -> (i32, i32) {
    %c0_i32 = arith.constant 0 : i32
    %c0_i32_0 = arith.constant 0 : i32
    return %arg0, %c0_i32 : i32, i32
  }
}

</mosaic_0001>

<bundles_post_ra>
// kernel: tpu_custom_call.1
= control target key start
LH: loop header
LB: loop body
LE: loop exit
PB: predicated region body
PF: predicated region fallthrough
CT: control target
= control target key end

     0   :  { %s1492_s0 = inlined_call_operand.<no memory space> [shape: s32[1], index: 0, kind: input, shape index: {}]   ;;  %s1493_s1 = inlined_call_operand.<no memory space> [shape: s32[1], index: 1, kind: input, shape index: {}]   ;;  %s1494_s2 = inlined_call_operand.hbm [shape: bf16[32,256], index: 2, kind: input, shape index: {}]   ;;  %s1495_s3 = inlined_call_operand.hbm [shape: bf16[256,256], index: 3, kind: input, shape index: {}]   ;;  %s1496_s4 = inlined_call_operand.vmem [shape: f32[1,256], index: 4, kind: input, shape index: {}]   ;;  %s1497_s5 = inlined_call_operand.vmem [shape: f32[32,1], index: 5, kind: output, shape index: {}]  }
   0x1   :  { %10 = sst [smem:[#allocation4]] %s1492_s0 }
   0x2   :  { %11 = sst [smem:[#allocation5]] %s1493_s1 }
   0x3   :  { %12 = vsyncpa [#allocation7], 0 }
   0x4   :  { %14 = vsyncpa [#allocation7 + $0x1], 0 }
   0x5   :  { %15 = vsyncpa [#allocation9], 0  ;;  %s1278_s22 = smov 0   ;;  %s1280_s23 = smov 0  }
   0x6   :  { %s1282_s24 = smov 0   ;;  %s1284_s25 = smov 0  }
   0x7   :  { %s1286_s26 = smov 0   ;;  %s1288_s27 = smov 0  }
   0x8   :  { %s1290_s0 = smov 0   ;;  %s1292_s28 = smov 0  }
   0x9 LB: > { %s791_s1 = sadd.s32 4294967295, %s1236_s28   ;;  %p57_p0 = scmp.ne.s32.totalorder %s1220_s25, %s1216_s24  ;;  %s1236_s28 = sphi %s1292_s28, %s21_s28   ;;  %s1232_s0 = sphi %s1290_s0, %s1513_s0   ;;  %s1228_s27 = sphi %s1288_s27, %s1512_s27   ;;  %s1224_s26 = sphi %s1286_s26, %s1511_s26   ;;  %s1220_s25 = sphi %s1284_s25, %s1510_s25   ;;  %s1216_s24 = sphi %s1282_s24, %s1509_s24   ;;  %s1212_s23 = sphi %s1280_s23, %s1473_s23   ;;  %s1208_s22 = sphi %s1278_s22, %s1508_s22  }
   0xa   : > { %p58_p1 = scmp.eq.s32.totalorder %s791_s1, 0  ;;  %s1316_s29 = sld [smem:[#allocation5]] }
   0xb   : > { %s68_s30 = sld [smem:[#allocation4]]  ;;  %p89_p3 = scmp.ne.s32.totalorder %s1212_s23, %s1208_s22 }
   0xc   : > { %p1318_p2 = por %p58_p1, %p57_p0  ;;  %p793_p4 = scmp.ge.s32.totalorder %s1236_s28, 1 }
   0xd   : > { %p154_p5 = scmp.lt.s32.totalorder %s1236_s28, 3  ;;  %p1325_p6 = por %p89_p3, %p58_p1 }
   0xe   : > { %s1238_s9 = smov [#allocation8]   ;;  %s1109_s1 = scalar_lea.hbm %s1495_s3, 256 }
   0xf   : > { %p1329_p7 = pnand %p793_p4, %p154_p5  ;;  %s1333_s10 = sshll.u32 %s1238_s9, 4  ;;  %s176_s10 = int_to_ptr.vmem [resolvable:$true] %s1333_s10 }
  0x10   : > { %s953_s11 = sshll.u32 %s1316_s29, 6 }
  0x11   : > { %p993_p8 = pneg %p1329_p7  ;;  %s795_s12 = sshll.u32 %s68_s30, 1 }
  0x12   : > { %s170_s13 = sadd.s32 %s953_s11, %s795_s12 }
  0x13   : > { %s797_s14 = sshll.u32 %s170_s13, 2  ;;  %p1344_p9 = pnand %p993_p8, %p1325_p6 }
  0x14   : > { %s172_s17 = scalar_lea.hbm %s1495_s3, %s797_s14 }
  0x15   : > { %s173_s19 = sshll.u32 %s172_s17, 4  ;;  %p1106_p11 = pneg %p1344_p9  ;;  %s174_s19 = int_to_ptr.hbm [resolvable:$true] %s173_s19 }
  0x16   : > { %s1102_s20 = sshra.s32 %s174_s19, 4  ;;  %s1103_s20 = int_to_ptr.hbm [resolvable:$true] %s1102_s20 }
  0x17   : > { %s1104_s21 = scalar_lea.hbm %s1103_s20, 256  ;;  %p1110_p0 = scmp.lt.s32.totalorder %s1103_s20, %s1495_s3 }
  0x18   : > { %p1105_p10 = scmp.ne.s32.totalorder %s1103_s20, %s1104_s21  ;;  %p1111_p1 = scmp.lt.s32.totalorder %s1109_s1, %s1104_s21 }
  0x1a   : > { %p1107_p12 = pnand %p1106_p11, %p1105_p10  ;;  %p1112_p3 = por %p1111_p1, %p1110_p0 }
  0x1c   : > { %p1108_p13 = pneg %p1107_p12 }
  0x1e   : > { %p1113_p4 = pnand %p1112_p3, %p1108_p13 }
  0x20   : > { %1116 = shalt.err (!%p1113_p4)
}
  0x21   : > { %s1498_s11 = smov 128   ;;  %s1499_s12 = smov 8  }
  0x22   : > { %996 = dma.hbm_to_vmem [thread:$0]  (!%p1344_p9), %s174_s19, 4096, %s176_s10, [#allocation9], %s1498_s11, %s1498_s11, %s1499_s12  }
  0x23   : > { %s33_s13 = sadd.s32 1, %s1232_s0  ;;  %s44_s14 = sadd.s32 1, %s1224_s26 }
  0x24   : > { %p35_p5 = scmp.ge.s32.totalorder %s33_s13, 2  ;;  %p51_p8 = scmp.ne.s32.totalorder %s1224_s26, %s1220_s25 }
  0x25   : > { %p52_p10 = scmp.eq.s32.totalorder %s1236_s28, 0  ;;  %p1001_p11 = scmp.lt.s32.totalorder %s1236_s28, 2 }
  0x26   : > { %s1515_s13 = smov (%p35_p5, %s33_s13), 0  ;;  %s199_s16 = sand.u32 1, %s1224_s26  }
  0x27   : > { %p1369_p12 = por %p52_p10, %p51_p8  ;;  %s39_s17 = ssub.s32 %s1232_s0, %s1515_s13 }
  0x28   : > { %s799_s18 = sshll.u32 %s199_s16, 4  ;;  %p42_p13 = scmp.eq.s32.totalorder %s39_s17, 0 }
  0x29   : > { %s801_s10 = sshll.u32 %s1316_s29, 1  ;;  %s954_s19 = sshll.u32 %s1232_s0, 2 }
  0x2a   : > { %s1379_s20 = scalar_select %p42_p13, %s1224_s26, %s44_s14  }
  0x2b   : > { %s210_s21 = sadd.s32 %s954_s19, %s801_s10  ;;  %s203_s22 = scalar_lea.vmem [#allocation6], %s799_s18 }
  0x2c   : > { %s215_s24 = sshll.u32 %s203_s22, 4  ;;  %s803_s1 = sshll.u32 %s210_s21, 2  ;;  %s216_s24 = int_to_ptr.vmem [resolvable:$true] %s215_s24 }
  0x2d   : > { %s212_s11 = scalar_lea.hbm %s1494_s2, %s803_s1  ;;  %p1388_p9 = pnand %p1001_p11, %p1369_p12 }
  0x2e   : > { %s213_s29 = sshll.u32 %s212_s11, 4  ;;  %s200_s14 = scalar_lea.sflag [#allocation7], %s199_s16  ;;  %s214_s29 = int_to_ptr.hbm [resolvable:$true] %s213_s29 }
  0x2f   : > { %s1132_s17 = sshra.s32 %s214_s29, 4  ;;  %p1136_p1 = pneg %p1388_p9  ;;  %s1133_s17 = int_to_ptr.hbm [resolvable:$true] %s1132_s17 }
  0x30   : > { %s1134_s18 = scalar_lea.hbm %s1133_s17, 16  ;;  %s1139_s15 = scalar_lea.hbm %s1494_s2, 32 }
  0x31   : > { %p1135_p0 = scmp.ne.s32.totalorder %s1133_s17, %s1134_s18  ;;  %p1140_p5 = scmp.lt.s32.totalorder %s1133_s17, %s1494_s2 }
  0x32   : > { %p1141_p8 = scmp.lt.s32.totalorder %s1139_s15, %s1134_s18 }
  0x33   : > { %p1137_p3 = pnand %p1136_p1, %p1135_p0 }
  0x34   : > { %p1142_p10 = por %p1141_p8, %p1140_p5 }
  0x35   : > { %p1138_p4 = pneg %p1137_p3 }
  0x37   : > { %p1143_p11 = pnand %p1142_p10, %p1138_p4 }
  0x39   : > { %1146 = shalt.err (!%p1143_p11)
}
  0x3a   : > { %s1506_s11 = smov 8   ;;  %s1507_s16 = smov 128  }
  0x3b   : > { %1000 = dma.hbm_to_vmem [thread:$0]  (!%p1388_p9), %s214_s29, 256, %s216_s24, %s200_s14, %s1507_s16, %s1507_s16, %s1506_s11  }
  0x3c   : > { %227 = sbr.rel (%p1329_p7) target bundleno = 444 (0x1bc), region = 32  ;;  %s229_s1 = sand.u32 (!%p1329_p7), 1, %s1220_s25  }
  0x3d   : > { %s805_s30 = sshll.u32 (!%p1329_p7), %s229_s1, 4  ;;  %s230_s9 = scalar_lea.sflag (!%p1329_p7), [#allocation7], %s229_s1 }
  0x3e   : > { %s1408_s10 = scalar_lea.vmem (!%p1329_p7), [#allocation6], %s805_s30 }
  0x41   : > { %1199 = dma.done.wait (%p1318_p2), %s230_s9, 256  }
  0x42   : > { %1201 = vsyncadd (%p1318_p2), %s230_s9, 4294967040 }
  0x43   : > { %1203 = dma.done.wait (%p1325_p6), [#allocation9], 4096  }
  0x44   : > { %1205 = vsyncadd (%p1325_p6), [#allocation9], 4294963200  ;;  %s807_s8 = sshll.u32 %s1228_s27, 1  ;;  %s1419_s12 = sld [smem:[#allocation4]]  ;;  %vm293_vm0 = vcmask 7168   ;;  %v1241_v0 = vmov 0.0  }
  0x45   : > { %p282_p7 = scmp.lt.s32.totalorder %s807_s8, 3  ;;  %s1421_s24 = sld [smem:[#allocation5]] }
  0x47   : > { %s1517_s8 = smov (!%p282_p7, %s807_s8), 3 }
  0x48   : > { %s808_s29 = sshll.u32 %s1517_s8, 3 }
  0x49   : > { %s1426_s17 = scalar_lea.vmem %s1497_s5, %s808_s29 }
  0x4a   : > { %s806_s7 = sshll.u32 %s1419_s12, 1  ;;  %294 = vst.msk [vmem:[%s1426_s17] sm:$0xff] %vm293_vm0, %v1241_v0 }
  0x4b   : > { %p276_p2 = scmp.lt.s32.totalorder %s806_s7, 1  ;;  %295 = vst.msk [vmem:[%s1426_s17 + $0x8] sm:$0xff] %vm293_vm0, %v1241_v0  ;;  %p809_p6 = scmp.ne.s32.totalorder %s1421_s24, 0 }
  0x4d   : > { %s1519_s7 = smov (!%p276_p2, %s806_s7), 1  ;;  %299 = sbr.rel (%p809_p6) target bundleno = 89 (0x59), region = 48 }
  0x4e   : > { %s278_s19 = scalar_lea.vmem %s1496_s4, %s1519_s7 }
  0x52   : > { %v300_v1 = vld [vmem:[%s278_s19] sm:$0x3] }
  0x53   : > { %v302_v2 = vperm.slane %v300_v1, 0  ;;  %v303_v3 = vperm.slane %v300_v1, 1 }
  0x55   : > { %306 = vst [vmem:[#allocation2 + $0x10] sm:$0xff] %v302_v2 }
  0x56   : > { %308 = vst [vmem:[#allocation2 + $0x18] sm:$0xff] %v302_v2 }
  0x57   : > { %307 = vst [vmem:[#allocation2] sm:$0xff] %v303_v3 }
  0x58   : > { %309 = vst [vmem:[#allocation2 + $0x8] sm:$0xff] %v303_v3 }
  0x59 PF: > { %v876_v4 = vld [vmem:[#allocation8 + $0x70] sm:$0xf]  ;;  %v972_v5 = vld [vmem:[#allocation8 + $0x74] sm:$0xf0]  ;;  %v971_v9 = vld [vmem:[#allocation8 + $0x74] sm:$0xf]  ;;  %p946_p12 = scmp.ne.s32.totalorder %s1421_s24, %s1419_s12 }
  0x5a   : > { %v940_v6 = vld [vmem:[#allocation8 + $0xf0] sm:$0xf]  ;;  %v877_v7 = vor.u32 %v972_v5, %v876_v4  ;;  %v988_v8 = vld [vmem:[#allocation8 + $0xf4] sm:$0xf0]  ;;  %v878_v10 = vld [vmem:[#allocation8 + $0x78] sm:$0xf0] }
  0x5b   : > { %v941_v11 = vor.u32 %v988_v8, %v940_v6  ;;  %v881_v12 = vor.u32 %v971_v9, %v878_v10  ;;  %v987_v13 = vld [vmem:[#allocation8 + $0xf4] sm:$0xf]  ;;  %v942_v14 = vld [vmem:[#allocation8 + $0xf8] sm:$0xf0]  ;;  %v868_v15 = vld [vmem:[#allocation8 + $0x60] sm:$0xf] }
  0x5c   : > { %518 = vmatpush.bf16.msra.mxu0 %v877_v7  ;;  %v945_v16 = vor.u32 %v987_v13, %v942_v14  ;;  %v970_v17 = vld [vmem:[#allocation8 + $0x64] sm:$0xf0]  ;;  %v932_v18 = vld [vmem:[#allocation8 + $0xe0] sm:$0xf]  ;;  %v969_v22 = vld [vmem:[#allocation8 + $0x64] sm:$0xf] }
  0x5d   : > { %v986_v19 = vld [vmem:[#allocation8 + $0xe4] sm:$0xf0]  ;;  %532 = vmatpush.bf16.msra.mxu1 %v941_v11  ;;  %546 = vmatpush.bf16.msra.mxu2 %v881_v12  ;;  %v869_v20 = vor.u32 %v970_v17, %v868_v15  ;;  %v870_v23 = vld [vmem:[#allocation8 + $0x68] sm:$0xf0]  ;;  %v985_v24 = vld [vmem:[#allocation8 + $0xe4] sm:$0xf] }
  0x5e   : > { %v933_v21 = vor.u32 %v986_v19, %v932_v18  ;;  %560 = vmatpush.bf16.msra.mxu3 %v945_v16  ;;  %v873_v25 = vor.u32 %v969_v22, %v870_v23  ;;  %v934_v26 = vld [vmem:[#allocation8 + $0xe8] sm:$0xf0]  ;;  %v860_v27 = vld [vmem:[#allocation8 + $0x50] sm:$0xf]  ;;  %v968_v28 = vld [vmem:[#allocation8 + $0x54] sm:$0xf0] }
  0x5f   : > { %v937_v29 = vor.u32 %v985_v24, %v934_v26  ;;  %v924_v30 = vld [vmem:[#allocation8 + $0xd0] sm:$0xf]  ;;  %v984_v31 = vld [vmem:[#allocation8 + $0xd4] sm:$0xf0]  ;;  %v967_v32 = vld [vmem:[#allocation8 + $0x54] sm:$0xf]  ;;  %v861_v33 = vor.u32 %v968_v28, %v860_v27 }
  0x60   : > { %519 = vmatpush.bf16.msra.mxu0 %v869_v20  ;;  %v862_v34 = vld [vmem:[#allocation8 + $0x58] sm:$0xf0]  ;;  %v983_v35 = vld [vmem:[#allocation8 + $0xd4] sm:$0xf]  ;;  %v925_v37 = vor.u32 %v984_v31, %v924_v30  ;;  %v852_v39 = vld [vmem:[#allocation8 + $0x40] sm:$0xf] }
  0x61   : > { %v926_v36 = vld [vmem:[#allocation8 + $0xd8] sm:$0xf0]  ;;  %533 = vmatpush.bf16.msra.mxu1 %v933_v21  ;;  %547 = vmatpush.bf16.msra.mxu2 %v873_v25  ;;  %v865_v38 = vor.u32 %v967_v32, %v862_v34  ;;  %v966_v40 = vld [vmem:[#allocation8 + $0x44] sm:$0xf0]  ;;  %v916_v41 = vld [vmem:[#allocation8 + $0xc0] sm:$0xf] }
  0x62   : > { %561 = vmatpush.bf16.msra.mxu3 %v937_v29  ;;  %v929_v42 = vor.u32 %v983_v35, %v926_v36  ;;  %v982_v43 = vld [vmem:[#allocation8 + $0xc4] sm:$0xf0]  ;;  %v965_v44 = vld [vmem:[#allocation8 + $0x44] sm:$0xf]  ;;  %v854_v45 = vld [vmem:[#allocation8 + $0x48] sm:$0xf0]  ;;  %v853_v48 = vor.u32 %v966_v40, %v852_v39 }
  0x63   : > { %v981_v46 = vld [vmem:[#allocation8 + $0xc4] sm:$0xf]  ;;  %v918_v47 = vld [vmem:[#allocation8 + $0xc8] sm:$0xf0]  ;;  %v917_v49 = vor.u32 %v982_v43, %v916_v41  ;;  %v857_v50 = vor.u32 %v965_v44, %v854_v45  ;;  %v844_v51 = vld [vmem:[#allocation8 + $0x30] sm:$0xf] }
  0x64   : > { %520 = vmatpush.bf16.msra.mxu0 %v861_v33  ;;  %v964_v52 = vld [vmem:[#allocation8 + $0x34] sm:$0xf0]  ;;  %v908_v53 = vld [vmem:[#allocation8 + $0xb0] sm:$0xf]  ;;  %v921_v54 = vor.u32 %v981_v46, %v918_v47  ;;  %v963_v56 = vld [vmem:[#allocation8 + $0x34] sm:$0xf] }
  0x65   : > { %534 = vmatpush.bf16.msra.mxu1 %v925_v37  ;;  %548 = vmatpush.bf16.msra.mxu2 %v865_v38  ;;  %v980_v55 = vld [vmem:[#allocation8 + $0xb4] sm:$0xf0]  ;;  %v846_v57 = vld [vmem:[#allocation8 + $0x38] sm:$0xf0]  ;;  %v979_v58 = vld [vmem:[#allocation8 + $0xb4] sm:$0xf]  ;;  %v845_v60 = vor.u32 %v964_v52, %v844_v51 }
  0x66   : > { %562 = vmatpush.bf16.msra.mxu3 %v929_v42  ;;  %v910_v59 = vld [vmem:[#allocation8 + $0xb8] sm:$0xf0]  ;;  %v909_v61 = vor.u32 %v980_v55, %v908_v53  ;;  %v849_v62 = vor.u32 %v963_v56, %v846_v57  ;;  %v836_v63 = vld [vmem:[#allocation8 + $0x20] sm:$0xf]  ;;  %v962_v0 = vld [vmem:[#allocation8 + $0x24] sm:$0xf0] }
  0x67   : > { %v900_v1 = vld [vmem:[#allocation8 + $0xa0] sm:$0xf]  ;;  %v913_v2 = vor.u32 %v979_v58, %v910_v59  ;;  %v978_v3 = vld [vmem:[#allocation8 + $0xa4] sm:$0xf0]  ;;  %v961_v4 = vld [vmem:[#allocation8 + $0x24] sm:$0xf]  ;;  %v837_v8 = vor.u32 %v962_v0, %v836_v63 }
  0x68   : > { %521 = vmatpush.bf16.msra.mxu0 %v853_v48  ;;  %v838_v5 = vld [vmem:[#allocation8 + $0x28] sm:$0xf0]  ;;  %v977_v6 = vld [vmem:[#allocation8 + $0xa4] sm:$0xf]  ;;  %v901_v9 = vor.u32 %v978_v3, %v900_v1  ;;  %v828_v11 = vld [vmem:[#allocation8 + $0x10] sm:$0xf] }
  0x69   : > { %535 = vmatpush.bf16.msra.mxu1 %v917_v49  ;;  %549 = vmatpush.bf16.msra.mxu2 %v857_v50  ;;  %v902_v7 = vld [vmem:[#allocation8 + $0xa8] sm:$0xf0]  ;;  %v841_v10 = vor.u32 %v961_v4, %v838_v5  ;;  %v960_v12 = vld [vmem:[#allocation8 + $0x14] sm:$0xf0]  ;;  %v892_v13 = vld [vmem:[#allocation8 + $0x90] sm:$0xf] }
  0x6a   : > { %563 = vmatpush.bf16.msra.mxu3 %v921_v54  ;;  %v905_v14 = vor.u32 %v977_v6, %v902_v7  ;;  %v976_v15 = vld [vmem:[#allocation8 + $0x94] sm:$0xf0]  ;;  %v959_v16 = vld [vmem:[#allocation8 + $0x14] sm:$0xf]  ;;  %v830_v17 = vld [vmem:[#allocation8 + $0x18] sm:$0xf0]  ;;  %v829_v20 = vor.u32 %v960_v12, %v828_v11 }
  0x6b   : > { %v975_v18 = vld [vmem:[#allocation8 + $0x94] sm:$0xf]  ;;  %v894_v19 = vld [vmem:[#allocation8 + $0x98] sm:$0xf0]  ;;  %v893_v21 = vor.u32 %v976_v15, %v892_v13  ;;  %v833_v22 = vor.u32 %v959_v16, %v830_v17  ;;  %v820_v23 = vld [vmem:[#allocation8] sm:$0xf] }
  0x6c   : > { %522 = vmatpush.bf16.msra.mxu0 %v845_v60  ;;  %v958_v24 = vld [vmem:[#allocation8 + $0x4] sm:$0xf0]  ;;  %v884_v25 = vld [vmem:[#allocation8 + $0x80] sm:$0xf]  ;;  %v897_v26 = vor.u32 %v975_v18, %v894_v19  ;;  %v957_v28 = vld [vmem:[#allocation8 + $0x4] sm:$0xf] }
  0x6d   : > { %536 = vmatpush.bf16.msra.mxu1 %v909_v61  ;;  %550 = vmatpush.bf16.msra.mxu2 %v849_v62  ;;  %v974_v27 = vld [vmem:[#allocation8 + $0x84] sm:$0xf0]  ;;  %v822_v29 = vld [vmem:[#allocation8 + $0x8] sm:$0xf0]  ;;  %v973_v30 = vld [vmem:[#allocation8 + $0x84] sm:$0xf]  ;;  %v821_v32 = vor.u32 %v958_v24, %v820_v23 }
  0x6e   : > { %564 = vmatpush.bf16.msra.mxu3 %v913_v2  ;;  %v886_v31 = vld [vmem:[#allocation8 + $0x88] sm:$0xf0]  ;;  %v812_v33 = vld [vmem:[%s1408_s10] sm:$0xf]  ;;  %v956_v34 = vld [vmem:[%s1408_s10 + $0x4] sm:$0xf0]  ;;  %v885_v35 = vor.u32 %v974_v27, %v884_v25  ;;  %v825_v36 = vor.u32 %v957_v28, %v822_v29 }
  0x6f   : > { %v955_v37 = vld [vmem:[%s1408_s10 + $0x4] sm:$0xf]  ;;  %v814_v38 = vld [vmem:[%s1408_s10 + $0x8] sm:$0xf0]  ;;  %v889_v39 = vor.u32 %v973_v30, %v886_v31  ;;  %v813_v40 = vor.u32 %v956_v34, %v812_v33 }
  0x70   : > { %523 = vmatpush.bf16.msra.mxu0 %v837_v8  ;;  %v817_v41 = vor.u32 %v955_v37, %v814_v38  ;;  %v310_v43 = vld [vmem:[#allocation2 + $0x10] sm:$0xff]  ;;  %v311_v48 = vld [vmem:[#allocation2] sm:$0xff]  ;;  %v312_v52 = vld [vmem:[#allocation2 + $0x18] sm:$0xff] }
  0x71   : > { %537 = vmatpush.bf16.msra.mxu1 %v901_v9  ;;  %551 = vmatpush.bf16.msra.mxu2 %v841_v10  ;;  %v313_v58 = vld [vmem:[#allocation2 + $0x8] sm:$0xff] }
  0x72   : > { %565 = vmatpush.bf16.msra.mxu3 %v905_v14 }
  0x74   : > { %524 = vmatpush.bf16.msra.mxu0 %v829_v20 }
  0x75   : > { %538 = vmatpush.bf16.msra.mxu1 %v893_v21  ;;  %552 = vmatpush.bf16.msra.mxu2 %v833_v22 }
  0x76   : > { %566 = vmatpush.bf16.msra.mxu3 %v897_v26 }
  0x78   : > { %525 = vmatpush.bf16.msra.mxu0 %v821_v32 }
  0x79   : > { %539 = vmatpush.bf16.msra.mxu1 %v885_v35  ;;  %553 = vmatpush.bf16.msra.mxu2 %v825_v36 }
  0x7a   : > { %567 = vmatpush.bf16.msra.mxu3 %v889_v39 }
  0x7b   : > { %526 = vmatmul.bf16.vlgmr.msra.gmra.mxu0 %v813_v40 }
  0x7c   : > { %540 = vmatmul.bf16.vlgmr.msra.gmra.mxu1 %v817_v41  ;;  %554 = vmatmul.bf16.vlgmr.msra.gmra.mxu2 %v813_v40 }
  0x7d   : > { %568 = vmatmul.bf16.vlgmr.msra.gmra.mxu3 %v817_v41 }
  0xf8   : > { %v527_v42 = vpop.f32.mrf.mxu0 }
  0xf9   : > { %v541_v44 = vpop.f32.mrf.mxu1 }
  0xfa   : > { %v542_v45 = vadd.f32 %v541_v44, %v527_v42 }
  0xfc   : > { %v574_v46 = vadd.f32 %v542_v45, %v310_v43 }
  0xfe   : > { %578 = vst [vmem:[#allocation2 + $0x10] sm:$0xff] %v574_v46 }
  0xff   : > { %v555_v47 = vpop.f32.mrf.mxu2 }
 0x100   : > { %v569_v49 = vpop.f32.mrf.mxu3  ;;  %v529_v50 = vpop.f32.mrf.mxu0 }
 0x101   : > { %v570_v51 = vadd.f32 %v569_v49, %v555_v47  ;;  %v543_v53 = vpop.f32.mrf.mxu1 }
 0x102   : > { %v544_v54 = vadd.f32 %v543_v53, %v529_v50 }
 0x103   : > { %v575_v55 = vadd.f32 %v570_v51, %v311_v48 }
 0x104   : > { %v576_v56 = vadd.f32 %v544_v54, %v312_v52 }
 0x105   : > { %579 = vst [vmem:[#allocation2] sm:$0xff] %v575_v55 }
 0x106   : > { %580 = vst [vmem:[#allocation2 + $0x18] sm:$0xff] %v576_v56 }
 0x107   : > { %v557_v57 = vpop.f32.mrf.mxu2 }
 0x108   : > { %v571_v59 = vpop.f32.mrf.mxu3 }
 0x109   : > { %v572_v60 = vadd.f32 %v571_v59, %v557_v57  ;;  %585 = sbr.rel (%p946_p12) target bundleno = 434 (0x1b2), region = 52 }
 0x10b   : > { %v577_v61 = vadd.f32 %v572_v60, %v313_v58 }
 0x10d   : > { %581 = vst [vmem:[#allocation2 + $0x8] sm:$0xff] %v577_v61 }
 0x10e   : > { %v586_v62 = vld [vmem:[#allocation2 + $0x10] sm:$0xff]  ;;  %v587_v63 = vld [vmem:[#allocation2] sm:$0xff]  ;;  %v1443_v0 = vld [vmem:[#allocation2 + $0x18] sm:$0xff] }
 0x10f   : > { %v590_v1 = vand.u32 2147483647, %v586_v62  ;;  %v591_v2 = vand.u32 2147483647, %v587_v63  ;;  %v592_v4 = vand.u32 2147483647, %v1443_v0 }
 0x110   : > { %vm614_vm1 = vcmp.ge.f32.partialorder %v586_v62, 0.0  ;;  %vm615_vm2 = vcmp.ge.f32.partialorder %v587_v63, 0.0  ;;  %v626_v25 = vmin.f32 %v586_v62, 0.0  ;;  %v627_v28 = vmin.f32 %v587_v63, 0.0 }
 0x111   : > { %v594_v5 = vsub.f32 0.0, %v590_v1  ;;  %v595_v6 = vsub.f32 0.0, %v591_v2  ;;  %v596_v8 = vsub.f32 0.0, %v592_v4  ;;  %vm616_vm3 = vcmp.ge.f32.partialorder %v1443_v0, 0.0 }
 0x112   : > { %v628_v36 = vmin.f32 %v1443_v0, 0.0 }
 0x113   : > { %v598_v9 = vmul.f32 1.442695, %v594_v5  ;;  %v600_v10 = vmul.f32 1.442695, %v595_v6  ;;  %v602_v12 = vmul.f32 1.442695, %v596_v8 }
 0x114   : > { %v1445_v3 = vld [vmem:[#allocation2 + $0x8] sm:$0xff]  ;;  %v662_v8 = vld [vmem:[%s1426_s17] sm:$0xff] }
 0x115   : > { %v593_v7 = vand.u32 2147483647, %v1445_v3  ;;  %1078 = vpow2.f32 %v598_v9  ;;  %vm617_vm4 = vcmp.ge.f32.partialorder %v1445_v3, 0.0  ;;  %v629_v41 = vmin.f32 %v1445_v3, 0.0 }
 0x116   : > { %1080 = vpow2.f32 %v600_v10  ;;  %v663_v10 = vld [vmem:[%s1426_s17 + $0x8] sm:$0xff] }
 0x117   : > { %v597_v11 = vsub.f32 0.0, %v593_v7  ;;  %1082 = vpow2.f32 %v602_v12 }
 0x119   : > { %v604_v13 = vmul.f32 1.442695, %v597_v11 }
 0x11b   : > { %1084 = vpow2.f32 %v604_v13  ;;  %v1079_v14 = vpop.eup %1078 }
 0x11c   : > { %v1081_v15 = vpop.eup %1080  ;;  %v606_v16 = vadd.f32 1.0, %v1079_v14 }
 0x11d   : > { %v1083_v17 = vpop.eup %1082  ;;  %v607_v18 = vadd.f32 1.0, %v1081_v15 }
 0x11e   : > { %1086 = vrcp.f32 %v606_v16  ;;  %v608_v20 = vadd.f32 1.0, %v1083_v17 }
 0x11f   : > { %1088 = vrcp.f32 %v607_v18 }
 0x120   : > { %1090 = vlog2.f32 %v606_v16 }
 0x121   : > { %v1085_v19 = vpop.eup %1084  ;;  %1092 = vlog2.f32 %v607_v18 }
 0x122   : > { %v609_v21 = vadd.f32 1.0, %v1085_v19  ;;  %1094 = vrcp.f32 %v608_v20 }
 0x124   : > { %1096 = vrcp.f32 %v609_v21  ;;  %v1087_v22 = vpop.eup %1086 }
 0x125   : > { %1098 = vlog2.f32 %v608_v20  ;;  %v1089_v23 = vpop.eup %1088  ;;  %v618_v24 = vsub.f32 1.0, %v1087_v22 }
 0x126   : > { %1100 = vlog2.f32 %v609_v21  ;;  %v1091_v26 = vpop.eup %1090  ;;  %v619_v27 = vsub.f32 1.0, %v1089_v23 }
 0x127   : > { %v1093_v29 = vpop.eup %1092  ;;  %v622_v30 = vsel %vm614_vm1, %v1087_v22, %v618_v24  ;;  %v631_v31 = vmul.f32 0.6931472, %v1091_v26 }
 0x128   : > { %v1095_v32 = vpop.eup %1094  ;;  %v623_v33 = vsel %vm615_vm2, %v1089_v23, %v619_v27  ;;  %v633_v34 = vmul.f32 0.6931472, %v1093_v29  ;;  %v646_v35 = vmul.f32 2.0, %v622_v30  ;;  %v642_v44 = vsub.f32 1.0, %v622_v30 }
 0x129   : > { %v638_v38 = vsub.f32 %v626_v25, %v631_v31  ;;  %v647_v39 = vmul.f32 2.0, %v623_v33  ;;  %v620_v40 = vsub.f32 1.0, %v1095_v32  ;;  %v643_v48 = vsub.f32 1.0, %v623_v33 }
 0x12a   : > { %v1097_v37 = vpop.eup %1096  ;;  %v639_v43 = vsub.f32 %v627_v28, %v633_v34  ;;  %v947_v45 = vadd.f32 -1.0, %v646_v35 }
 0x12b   : > { %v1099_v42 = vpop.eup %1098  ;;  %v621_v46 = vsub.f32 1.0, %v1097_v37  ;;  %v948_v49 = vadd.f32 -1.0, %v647_v39  ;;  %v624_v50 = vsel %vm616_vm3, %v1095_v32, %v620_v40 }
 0x12c   : > { %v1101_v47 = vpop.eup %1100  ;;  %v635_v51 = vmul.f32 0.6931472, %v1099_v42  ;;  %v654_v52 = vmul.f32 %v947_v45, %v638_v38  ;;  %v648_v57 = vmul.f32 2.0, %v624_v50  ;;  %v644_v62 = vsub.f32 1.0, %v624_v50 }
 0x12d   : > { %v625_v53 = vsel %vm617_vm4, %v1097_v37, %v621_v46  ;;  %v637_v54 = vmul.f32 0.6931472, %v1101_v47  ;;  %v655_v55 = vmul.f32 %v948_v49, %v639_v43 }
 0x12e   : > { %v640_v56 = vsub.f32 %v628_v36, %v635_v51  ;;  %v658_v58 = vadd.f32 %v654_v52, %v642_v44  ;;  %v649_v60 = vmul.f32 2.0, %v625_v53  ;;  %v949_v63 = vadd.f32 -1.0, %v648_v57 }
 0x12f   : > { %v641_v59 = vsub.f32 %v629_v41, %v637_v54  ;;  %v659_v61 = vadd.f32 %v655_v55, %v643_v48  ;;  %v645_v0 = vsub.f32 1.0, %v625_v53 }
 0x130   : > { %v950_v1 = vadd.f32 -1.0, %v649_v60  ;;  %v656_v4 = vmul.f32 %v949_v63, %v640_v56 }
 0x131   : > { %v664_v2 = vadd.f32 %v659_v61, %v658_v58 }
 0x132   : > { %v657_v3 = vmul.f32 %v950_v1, %v641_v59  ;;  %v660_v5 = vadd.f32 %v656_v4, %v644_v62 }
 0x133   : > { %665 = vadd.xlane.f32.xlu0 %v664_v2 }
 0x134   : > { %v661_v6 = vadd.f32 %v657_v3, %v645_v0 }
 0x136   : > { %v667_v7 = vadd.f32 %v661_v6, %v660_v5 }
 0x13b   : > { %668 = vadd.xlane.f32.xlu0 %v667_v7 }
 0x1a6   : > { %v666_v9 = vpop.xlane.xlu0 %665 }
 0x1a7   : > { %v670_v11 = vadd.f32 %v666_v9, %v662_v8 }
 0x1a9   : > { %673 = vst.msk [vmem:[%s1426_s17] sm:$0xff] %vm293_vm0, %v670_v11 }
 0x1ae   : > { %v669_v12 = vpop.xlane.xlu0 %668 }
 0x1af   : > { %v671_v13 = vadd.f32 %v669_v12, %v663_v10 }
 0x1b1   : > { %674 = vst.msk [vmem:[%s1426_s17 + $0x8] sm:$0xff] %vm293_vm0, %v671_v13 }
 0x1b2 PF: > { %v678_v14 = vld [vmem:[%s1426_s17] sm:$0xff] }
 0x1b3   : > { %v680_v16 = vmul.f32 0.00390625, %v678_v14 }
 0x1b5   : > { %683 = vst.msk [vmem:[%s1426_s17] sm:$0xff] %vm293_vm0, %v680_v16 }
 0x1b8   : > { %v679_v15 = vld [vmem:[%s1426_s17 + $0x8] sm:$0xff] }
 0x1b9   : > { %v681_v17 = vmul.f32 0.00390625, %v679_v15 }
 0x1bb   : > { %684 = vst.msk [vmem:[%s1426_s17 + $0x8] sm:$0xff] %vm293_vm0, %v681_v17 }
 0x1bc PF: > { %s21_s28 = sadd.s32 1, %s1236_s28   ;;  %s1508_s22 = smov %s1212_s23 }
 0x1bd   : > { %p18_p13 = scmp.ge.s32.totalorder %s21_s28, 4   ;;  %s1473_s23 = smov 0  }
 0x1be   : > { %s1509_s24 = smov %s1220_s25  ;;  %s1510_s25 = smov %s1224_s26 }
 0x1bf   : > { %s1511_s26 = smov %s1379_s20  ;;  %s1512_s27 = smov %s1232_s0 }
 0x1c0   : > { %s1513_s0 = smov %s1515_s13  ;;  %20 = sbr.rel (!%p18_p13) target bundleno = 9 (0x9), region = 96 }
 0x1c5   :  { %707 = vsyncpa [#allocation7], 1 }
 0x1c6   :  { %709 = vsyncpa [#allocation7 + $0x1], 1 }
 0x1c7   :  { %710 = vsyncpa [#allocation9], 1 }

</bundles_post_ra>
